<compile_context>
chip_gen: v7x
topology: tpu7x:2x2x1
jax: 0.10.0
libtpu: 0.0.40
codegen_flags: <defaults>
</compile_context>

<pallas_src>
import functools

import jax
import jax.numpy as jnp
from jax import lax
from jax.experimental import pallas as pl
from jax.experimental.pallas import tpu as pltpu

HIDDEN = 64            # per-network hidden width (from the PyTorch module)
HP = 2 * HIDDEN        # packed hidden width (actor || critic) = 128, lane-aligned


def _round_up(x, m):
    return ((x + m - 1) // m) * m


def _sublane(dtype):
    # Native sublane tiling per dtype: f32 -> 8, bf16 -> 16, int8/fp8 -> 32.
    return {4: 8, 2: 16, 1: 32}.get(jnp.dtype(dtype).itemsize, 8)


# ---------------------------------------------------------------------------
# Pallas kernel: fused actor+critic forward for one batch tile.
# ---------------------------------------------------------------------------
def _fused_actor_critic_kernel(
    s_ref,                    # [TB, S]
    w1_ref, b1_ref,           # [S, 128],   [1, 128]
    w2_ref, b2_ref,           # [128, 128], [1, 128]   (block-diagonal)
    w3_ref, b3_ref,           # [128, OUTW],[1, OUTW]  (zero-padded head)
    out_ref,                  # [TB, OUTW]  lanes 0..A-1: probs/means, lane A: value
    *,
    action_dim,
    compute_dtype,
    approx_recip,
    continuous,
):
    s = s_ref[...].astype(compute_dtype)

    # Packed layer 1: [TB, S] @ [S, 128]; lanes 0..63 actor, 64..127 critic.
    # bf16 MXU operands, f32 accumulation; bias-add / tanh stay in f32.
    h = jnp.tanh(
        jnp.dot(s, w1_ref[...].astype(compute_dtype),
                preferred_element_type=jnp.float32) + b1_ref[...]
    )
    # Packed layer 2: block-diagonal keeps actor/critic paths independent.
    h = jnp.tanh(
        jnp.dot(h.astype(compute_dtype), w2_ref[...].astype(compute_dtype),
                preferred_element_type=jnp.float32) + b2_ref[...]
    )
    # Packed head: lanes 0..A-1 actor logits, lane A critic value, rest zero.
    y = (
        jnp.dot(h.astype(compute_dtype), w3_ref[...].astype(compute_dtype),
                preferred_element_type=jnp.float32) + b3_ref[...]
    )

    lane = lax.broadcasted_iota(jnp.int32, y.shape, dimension=1)
    is_actor = lane < action_dim

    if continuous:
        # Continuous action space: actor head is Tanh (action means).
        actor_out = jnp.where(is_actor, jnp.tanh(y), 0.0)
    else:
        # Numerically-stable softmax over the actor lanes only.
        logits = jnp.where(is_actor, y, -jnp.inf)
        m = jnp.max(logits, axis=-1, keepdims=True)
        e = jnp.exp(logits - m)            # exp(-inf) == 0 on non-actor lanes
        denom = jnp.sum(e, axis=-1, keepdims=True)
        if approx_recip:
            actor_out = e * pl.reciprocal(denom, approx=True)
        else:
            actor_out = e / denom          # exact: probs sum to 1 (PPO ratios)

    # Lane A carries the critic value; other non-actor lanes stay 0.
    out_ref[...] = jnp.where(lane == action_dim, y, actor_out).astype(out_ref.dtype)


# ---------------------------------------------------------------------------
# Host-side weight packing (actor || critic fusion).  Default: bf16 operands.
# ---------------------------------------------------------------------------
def pack_actor_critic_params(p, action_dim, weight_dtype=jnp.bfloat16):
    A = action_dim
    out_w = _round_up(A + 1, 128)   # lane-dense output slab width

    w1 = jnp.concatenate([p["aw1"], p["cw1"]], axis=1)            # [S, 128]
    b1 = jnp.concatenate([p["ab1"], p["cb1"]], axis=1)            # [1, 128]

    w2 = jnp.zeros((HP, HP), jnp.float32)
    w2 = w2.at[:HIDDEN, :HIDDEN].set(p["aw2"])
    w2 = w2.at[HIDDEN:, HIDDEN:].set(p["cw2"])                    # block-diagonal
    b2 = jnp.concatenate([p["ab2"], p["cb2"]], axis=1)            # [1, 128]

    w3 = jnp.zeros((HP, out_w), jnp.float32)
    w3 = w3.at[:HIDDEN, :A].set(p["aw3"])
    w3 = w3.at[HIDDEN:, A:A + 1].set(p["cw3"])
    b3 = jnp.zeros((1, out_w), jnp.float32)
    b3 = b3.at[:, :A].set(p["ab3"])
    b3 = b3.at[:, A:A + 1].set(p["cb3"])

    return dict(
        w1=w1.astype(weight_dtype), b1=b1,           # biases stay f32 (f32 accum)
        w2=w2.astype(weight_dtype), b2=b2,
        w3=w3.astype(weight_dtype), b3=b3,
        action_dim=A, out_width=out_w,
    )


# ---------------------------------------------------------------------------
# Wrapper: batch grid (partial last block, no pad), lane-dense output, slice.
# ---------------------------------------------------------------------------
def actor_critic_forward(state, packed, *, block_b=1024,
                         compute_dtype=jnp.bfloat16, out_dtype=jnp.float32,
                         approx_recip=False, continuous=False):
    """state: [B, state_dim] f32 -> (probs/means [B, A], values [B, 1])."""
    B, S = state.shape
    A = packed["action_dim"]
    out_w = packed["out_width"]

    # Batch tile: multiple of the sublane tiling of the output dtype, and
    # chosen so the grid has >= 2 steps whenever possible (v7x megacore:
    # "parallel" batch axis shards across both TensorCores).
    align = max(8, _sublane(out_dtype))
    half = _round_up(pl.cdiv(_round_up(B, align), 2), align)
    TB = min(_round_up(block_b, align), half)
    grid = (pl.cdiv(B, TB),)   # partial last block OK: math is row-local,
                               # OOB rows are discarded by the masked store.

    w1, b1 = packed["w1"], packed["b1"]
    w2, b2 = packed["w2"], packed["b2"]
    w3, b3 = packed["w3"], packed["b3"]

    kernel = functools.partial(
        _fused_actor_critic_kernel,
        action_dim=A, compute_dtype=compute_dtype,
        approx_recip=approx_recip, continuous=continuous,
    )

    wbytes = jnp.dtype(w1.dtype).itemsize
    obytes = jnp.dtype(out_dtype).itemsize
    flops = 2 * B * (S * HP + HP * HP + HP * out_w)
    transcendentals = B * (2 * HP + out_w)              # tanh x2 layers + exp/tanh head
    bytes_accessed = (
        B * S * 4 + B * out_w * obytes
        + (w1.size + w2.size + w3.size) * wbytes
        + (b1.size + b2.size + b3.size) * 4
    )

    state_spec = pl.BlockSpec((TB, S), lambda i: (i, 0))

    def _resident(arr):  # full-extent block, constant index -> VMEM-resident
        return pl.BlockSpec(arr.shape, lambda i: (0, 0))

    out = pl.pallas_call(
        kernel,
        out_shape=jax.ShapeDtypeStruct((B, out_w), out_dtype),
        grid=grid,
        in_specs=[
            state_spec,
            _resident(w1), _resident(b1),
            _resident(w2), _resident(b2),
            _resident(w3), _resident(b3),
        ],
        out_specs=pl.BlockSpec((TB, out_w), lambda i: (i, 0)),
        compiler_params=pltpu.CompilerParams(
            dimension_semantics=("parallel",),
        ),
        cost_estimate=pl.CostEstimate(
            flops=int(flops),
            transcendentals=int(transcendentals),
            bytes_accessed=int(bytes_accessed),
        ),
    )(state, w1, b1, w2, b2, w3, b3)

    probs = out[:, :A]
    values = out[:, A:A + 1]
    return probs, values


# ---------------------------------------------------------------------------
# Deterministic parameter initialization (mimics nn.Linear's uniform init).
# ---------------------------------------------------------------------------
def _init_linear(key, fan_in, fan_out):
    kw, kb = jax.random.split(key)
    bound = 1.0 / jnp.sqrt(jnp.float32(fan_in))
    w = jax.random.uniform(kw, (fan_in, fan_out), jnp.float32, -bound, bound)
    b = jax.random.uniform(kb, (1, fan_out), jnp.float32, -bound, bound)
    return w, b


def init_actor_critic_params(key, state_dim, action_dim, hidden=HIDDEN):
    keys = jax.random.split(key, 6)
    aw1, ab1 = _init_linear(keys[0], state_dim, hidden)
    aw2, ab2 = _init_linear(keys[1], hidden, hidden)
    aw3, ab3 = _init_linear(keys[2], hidden, action_dim)
    cw1, cb1 = _init_linear(keys[3], state_dim, hidden)
    cw2, cb2 = _init_linear(keys[4], hidden, hidden)
    cw3, cb3 = _init_linear(keys[5], hidden, 1)
    return dict(
        aw1=aw1, ab1=ab1, aw2=aw2, ab2=ab2, aw3=aw3, ab3=ab3,
        cw1=cw1, cb1=cb1, cw2=cw2, cb2=cb2, cw3=cw3, cb3=cb3,
    )


# Pure-JAX reference (unpacked weights) for correctness checking.
def _reference_forward(state, p, continuous=False):
    h = jnp.tanh(state @ p["aw1"] + p["ab1"])
    h = jnp.tanh(h @ p["aw2"] + p["ab2"])
    logits = h @ p["aw3"] + p["ab3"]
    actor = jnp.tanh(logits) if continuous else jax.nn.softmax(logits, axis=-1)
    c = jnp.tanh(state @ p["cw1"] + p["cb1"])
    c = jnp.tanh(c @ p["cw2"] + p["cb2"])
    values = c @ p["cw3"] + p["cb3"]
    return actor, values


if __name__ == "__main__":
    # Small shapes consistent with the module (discrete action space).
    B, STATE_DIM, ACTION_DIM = 8, 16, 4

    key = jax.random.PRNGKey(0)
    k_state, k_params = jax.random.split(key)

    state = jax.random.normal(k_state, (B, STATE_DIM), dtype=jnp.float32)
    params = init_actor_critic_params(k_params, STATE_DIM, ACTION_DIM)
    ref_probs, ref_values = _reference_forward(state, params)

    # ---- Exact f32 path (semantics check, discrete/softmax head). ----
    packed_f32 = pack_actor_critic_params(params, ACTION_DIM, weight_dtype=jnp.float32)
    probs32, values32 = actor_critic_forward(state, packed_f32,
                                             compute_dtype=jnp.float32)
    jax.block_until_ready((probs32, values32))
    assert probs32.shape == (B, ACTION_DIM)
    assert values32.shape == (B, 1)
    assert jnp.allclose(values32, ref_values, atol=1e-4, rtol=1e-4)
    assert jnp.allclose(probs32, ref_probs, atol=1e-4, rtol=1e-4)
    assert jnp.allclose(jnp.sum(probs32, axis=-1), 1.0, atol=1e-5)

    # ---- Continuous-action head (Tanh actor output). ----
    mean_c, values_c = actor_critic_forward(state, packed_f32,
                                            compute_dtype=jnp.float32,
                                            continuous=True)
    jax.block_until_ready((mean_c, values_c))
    ref_mean, _ = _reference_forward(state, params, continuous=True)
    assert jnp.allclose(mean_c, ref_mean, atol=1e-4, rtol=1e-4)

    # ---- Default fast path: bf16 MXU operands, f32 accumulation/output. ----
    packed = pack_actor_critic_params(params, ACTION_DIM)   # bf16 weights (default)
    probs, values = actor_critic_forward(state, packed)
    jax.block_until_ready((probs, values))
    assert jnp.allclose(values, ref_values, atol=3e-2, rtol=3e-2)
    assert jnp.allclose(probs, ref_probs, atol=3e-2, rtol=3e-2)
    # Exact softmax division (approx_recip=False): probs still sum to ~1.
    assert jnp.allclose(jnp.sum(probs, axis=-1), 1.0, atol=1e-5)

    # ---- Larger, non-tile-aligned batch: partial last block (no host pad),
    #      bf16 output slab (halved writeback). ----
    B2 = 777
    state2 = jax.random.normal(jax.random.PRNGKey(1), (B2, STATE_DIM), jnp.float32)
    probs2, values2 = actor_critic_forward(state2, packed, block_b=256,
                                           out_dtype=jnp.bfloat16)
    jax.block_until_ready((probs2, values2))
    ref_probs2, ref_values2 = _reference_forward(state2, params)
    assert probs2.shape == (B2, ACTION_DIM)
    assert values2.shape == (B2, 1)
    assert jnp.allclose(values2.astype(jnp.float32), ref_values2, atol=4e-2, rtol=4e-2)
    assert jnp.allclose(probs2.astype(jnp.float32), ref_probs2, atol=4e-2, rtol=4e-2)

    # TODO(synk): Categorical / MultivariateNormal sampling, log_prob, entropy
    # and the epsilon-greedy exploration in act()/evaluate() are host-side RNG
    # and control flow, left in plain JAX outside the kernel.
    print("KERNEL_OK")
</pallas_src>

<mosaic_0001>
module attributes {stable_mosaic.version = 11 : i64} {
  func.func @_fused_actor_critic_kernel(%arg0: i32, %arg1: memref<8x16xf32, #tpu.memory_space<vmem>>, %arg2: memref<16x128xf32, #tpu.memory_space<vmem>>, %arg3: memref<1x128xf32, #tpu.memory_space<vmem>>, %arg4: memref<128x128xf32, #tpu.memory_space<vmem>>, %arg5: memref<1x128xf32, #tpu.memory_space<vmem>>, %arg6: memref<128x128xf32, #tpu.memory_space<vmem>>, %arg7: memref<1x128xf32, #tpu.memory_space<vmem>>, %arg8: memref<8x128xf32, #tpu.memory_space<vmem>>) attributes {dimension_semantics = [#tpu.dimension_semantics<parallel>], iteration_bounds = array<i64: 1>, scalar_prefetch = 0 : i64, scratch_operands = 0 : i64, tpu.core_type = #tpu.core_type<tc>, window_params = [{transform_indices = @transform_0, window_bounds = array<i64: 8, 16>}, {pipeline_mode = #tpu.pipeline_mode<synchronous>, transform_indices = @transform_1, window_bounds = array<i64: 16, 128>}, {pipeline_mode = #tpu.pipeline_mode<synchronous>, transform_indices = @transform_2, window_bounds = array<i64: 1, 128>}, {pipeline_mode = #tpu.pipeline_mode<synchronous>, transform_indices = @transform_3, window_bounds = array<i64: 128, 128>}, {pipeline_mode = #tpu.pipeline_mode<synchronous>, transform_indices = @transform_4, window_bounds = array<i64: 1, 128>}, {pipeline_mode = #tpu.pipeline_mode<synchronous>, transform_indices = @transform_5, window_bounds = array<i64: 128, 128>}, {pipeline_mode = #tpu.pipeline_mode<synchronous>, transform_indices = @transform_6, window_bounds = array<i64: 1, 128>}, {transform_indices = @transform_7, window_bounds = array<i64: 8, 128>}]} {
    %c0 = arith.constant 0 : index
    %c0_0 = arith.constant 0 : index
    %0 = vector.load %arg1[%c0, %c0_0] : memref<8x16xf32, #tpu.memory_space<vmem>>, vector<8x16xf32>
    %c0_1 = arith.constant 0 : index
    %c0_2 = arith.constant 0 : index
    %1 = vector.load %arg2[%c0_1, %c0_2] : memref<16x128xf32, #tpu.memory_space<vmem>>, vector<16x128xf32>
    %cst = arith.constant dense<0.000000e+00> : vector<8x128xf32>
    %2 = tpu.matmul %0, %1, %cst {dimension_numbers = #tpu.dot_dimension_numbers<[1], [0], [0], [1], [0, 0, 1, 1], [], []>} : vector<8x16xf32>, vector<16x128xf32>, vector<8x128xf32> -> vector<8x128xf32>
    %c0_3 = arith.constant 0 : index
    %c0_4 = arith.constant 0 : index
    %3 = vector.load %arg3[%c0_3, %c0_4] : memref<1x128xf32, #tpu.memory_space<vmem>>, vector<1x128xf32>
    %4 = vector.broadcast %3 : vector<1x128xf32> to vector<8x128xf32>
    %5 = arith.addf %2, %4 : vector<8x128xf32>
    %6 = math.tanh %5 : vector<8x128xf32>
    %c0_5 = arith.constant 0 : index
    %c0_6 = arith.constant 0 : index
    %7 = vector.load %arg4[%c0_5, %c0_6] : memref<128x128xf32, #tpu.memory_space<vmem>>, vector<128x128xf32>
    %cst_7 = arith.constant dense<0.000000e+00> : vector<8x128xf32>
    %8 = tpu.matmul %6, %7, %cst_7 {dimension_numbers = #tpu.dot_dimension_numbers<[1], [0], [0], [1], [0, 0, 1, 1], [], []>} : vector<8x128xf32>, vector<128x128xf32>, vector<8x128xf32> -> vector<8x128xf32>
    %c0_8 = arith.constant 0 : index
    %c0_9 = arith.constant 0 : index
    %9 = vector.load %arg5[%c0_8, %c0_9] : memref<1x128xf32, #tpu.memory_space<vmem>>, vector<1x128xf32>
    %10 = vector.broadcast %9 : vector<1x128xf32> to vector<8x128xf32>
    %11 = arith.addf %8, %10 : vector<8x128xf32>
    %12 = math.tanh %11 : vector<8x128xf32>
    %c0_10 = arith.constant 0 : index
    %c0_11 = arith.constant 0 : index
    %13 = vector.load %arg6[%c0_10, %c0_11] : memref<128x128xf32, #tpu.memory_space<vmem>>, vector<128x128xf32>
    %cst_12 = arith.constant dense<0.000000e+00> : vector<8x128xf32>
    %14 = tpu.matmul %12, %13, %cst_12 {dimension_numbers = #tpu.dot_dimension_numbers<[1], [0], [0], [1], [0, 0, 1, 1], [], []>} : vector<8x128xf32>, vector<128x128xf32>, vector<8x128xf32> -> vector<8x128xf32>
    %c0_13 = arith.constant 0 : index
    %c0_14 = arith.constant 0 : index
    %15 = vector.load %arg7[%c0_13, %c0_14] : memref<1x128xf32, #tpu.memory_space<vmem>>, vector<1x128xf32>
    %16 = vector.broadcast %15 : vector<1x128xf32> to vector<8x128xf32>
    %17 = arith.addf %14, %16 : vector<8x128xf32>
    %18 = tpu.iota {dimensions = array<i32: 1>} : vector<8x128xi32>
    %c4_i32 = arith.constant 4 : i32
    %19 = vector.broadcast %c4_i32 : i32 to vector<8x128xi32>
    %20 = arith.cmpi slt, %18, %19 : vector<8x128xi32>
    %cst_15 = arith.constant 0xFF800000 : f32
    %21 = vector.broadcast %cst_15 : f32 to vector<8x128xf32>
    %22 = arith.select %20, %17, %21 : vector<8x128xi1>, vector<8x128xf32>
    %cst_16 = arith.constant dense<0xFF800000> : vector<8xf32>
    %23 = vector.multi_reduction <maximumf>, %22, %cst_16 [1] : vector<8x128xf32> to vector<8xf32>
    %24 = vector.shape_cast %23 : vector<8xf32> to vector<8x1xf32>
    %25 = vector.broadcast %24 : vector<8x1xf32> to vector<8x128xf32>
    %26 = arith.subf %22, %25 : vector<8x128xf32>
    %27 = math.exp %26 : vector<8x128xf32>
    %cst_17 = arith.constant dense<0.000000e+00> : vector<8xf32>
    %28 = vector.multi_reduction <add>, %27, %cst_17 [1] : vector<8x128xf32> to vector<8xf32>
    %29 = vector.shape_cast %28 : vector<8xf32> to vector<8x1xf32>
    %30 = vector.broadcast %29 : vector<8x1xf32> to vector<8x128xf32>
    %31 = arith.divf %27, %30 : vector<8x128xf32>
    %c4_i32_18 = arith.constant 4 : i32
    %32 = vector.broadcast %c4_i32_18 : i32 to vector<8x128xi32>
    %33 = arith.cmpi eq, %18, %32 : vector<8x128xi32>
    %34 = arith.select %33, %17, %31 : vector<8x128xi1>, vector<8x128xf32>
    %c0_19 = arith.constant 0 : index
    %c0_20 = arith.constant 0 : index
    %35 = vector.load %arg8[%c0_19, %c0_20] : memref<8x128xf32, #tpu.memory_space<vmem>>, vector<8x128xf32>
    tpu.vector_store %arg8[%c0_19, %c0_20], %34 {strides = array<i32>} : memref<8x128xf32, #tpu.memory_space<vmem>>, vector<8x128xf32>,
    return
  }
  func.func @transform_0(%arg0: i32) -> (i32, i32) {
    %c0_i32 = arith.constant 0 : i32
    %c0_i32_0 = arith.constant 0 : i32
    return %arg0, %c0_i32 : i32, i32
  }
  func.func @transform_1(%arg0: i32) -> (i32, i32) {
    %c0_i32 = arith.constant 0 : i32
    %c0_i32_0 = arith.constant 0 : i32
    %c0_i32_1 = arith.constant 0 : i32
    return %c0_i32, %c0_i32_0 : i32, i32
  }
  func.func @transform_2(%arg0: i32) -> (i32, i32) {
    %c0_i32 = arith.constant 0 : i32
    %c0_i32_0 = arith.constant 0 : i32
    %c0_i32_1 = arith.constant 0 : i32
    return %c0_i32, %c0_i32_0 : i32, i32
  }
  func.func @transform_3(%arg0: i32) -> (i32, i32) {
    %c0_i32 = arith.constant 0 : i32
    %c0_i32_0 = arith.constant 0 : i32
    %c0_i32_1 = arith.constant 0 : i32
    return %c0_i32, %c0_i32_0 : i32, i32
  }
  func.func @transform_4(%arg0: i32) -> (i32, i32) {
    %c0_i32 = arith.constant 0 : i32
    %c0_i32_0 = arith.constant 0 : i32
    %c0_i32_1 = arith.constant 0 : i32
    return %c0_i32, %c0_i32_0 : i32, i32
  }
  func.func @transform_5(%arg0: i32) -> (i32, i32) {
    %c0_i32 = arith.constant 0 : i32
    %c0_i32_0 = arith.constant 0 : i32
    %c0_i32_1 = arith.constant 0 : i32
    return %c0_i32, %c0_i32_0 : i32, i32
  }
  func.func @transform_6(%arg0: i32) -> (i32, i32) {
    %c0_i32 = arith.constant 0 : i32
    %c0_i32_0 = arith.constant 0 : i32
    %c0_i32_1 = arith.constant 0 : i32
    return %c0_i32, %c0_i32_0 : i32, i32
  }
  func.func @transform_7(%arg0: i32) -> (i32, i32) {
    %c0_i32 = arith.constant 0 : i32
    %c0_i32_0 = arith.constant 0 : i32
    return %arg0, %c0_i32 : i32, i32
  }
}

</mosaic_0001>

<bundles_post_ra>
// kernel: tpu_custom_call.1
= control target key start
LH: loop header
LB: loop body
LE: loop exit
PB: predicated region body
PF: predicated region fallthrough
CT: control target
= control target key end

     0   :  { %12 = vsyncpa [#allocation3], 0  ;;  %s838_s0 = inlined_call_operand.hbm [shape: f32[8,16], index: 0, kind: input, shape index: {}]   ;;  %s839_s1 = inlined_call_operand.hbm [shape: f32[16,128], index: 1, kind: input, shape index: {}]   ;;  %s840_s2 = inlined_call_operand.vmem [shape: f32[1,128], index: 2, kind: input, shape index: {}]   ;;  %s841_s3 = inlined_call_operand.hbm [shape: f32[128,128], index: 3, kind: input, shape index: {}]   ;;  %s842_s4 = inlined_call_operand.vmem [shape: f32[1,128], index: 4, kind: input, shape index: {}]   ;;  %s843_s5 = inlined_call_operand.hbm [shape: f32[128,128], index: 5, kind: input, shape index: {}]   ;;  %s844_s6 = inlined_call_operand.vmem [shape: f32[1,128], index: 6, kind: input, shape index: {}]   ;;  %s845_s7 = inlined_call_operand.hbm [shape: f32[8,128], index: 7, kind: output, shape index: {}]  }
   0x1   :  { %13 = vsyncpa [#allocation6], 0 }
   0x2   :  { %14 = vsyncpa [#allocation9], 0 }
   0x3   :  { %15 = vsyncpa [#allocation4], 0  ;;  %s690_s24 = smov [#allocation5]   ;;  %s572_s28 = scalar_lea.hbm %s839_s1, 256 }
   0x4   :  { %s31_s25 = sshll.u32 %s690_s24, 4  ;;  %p573_p0 = scmp.ne.s32.totalorder %s839_s1, %s572_s28  ;;  %s32_s25 = int_to_ptr.vmem [resolvable:$true] %s31_s25 }
   0x5   :  { %p576_p1 = scmp.lt.u32.totalorder %s572_s28, %s839_s1 }
   0x7   :  { %p578_p2 = pnand %p576_p1, %p573_p0 }
   0x9   :  { %581 = shalt.err (!%p578_p2)
}
   0xa   :  { %s582_s10 = scalar_lea.vmem %s32_s25, 256  ;;  %p587_p4 = scmp.lt.s32.totalorder %s32_s25, %s32_s25 }
   0xb   :  { %p583_p3 = scmp.ne.s32.totalorder %s32_s25, %s582_s10  ;;  %p588_p5 = scmp.lt.s32.totalorder %s582_s10, %s582_s10 }
   0xd   :  { %p589_p6 = por %p588_p5, %p587_p4 }
   0xf   :  { %p590_p7 = pnand %p589_p6, %p583_p3 }
  0x11   :  { %593 = shalt.err (!%p590_p7)
}
  0x12   :  { %s691_s11 = smov 128   ;;  %s692_s12 = smov 8  }
  0x13   :  { %37 = dma.hbm_to_vmem [thread:$0]  %s839_s1, 256, %s32_s25, [#allocation6], %s691_s11, %s691_s11, %s692_s12  }
  0x14   :  { %s693_s15 = smov [#allocation2]   ;;  %s694_s17 = smov [#allocation7]  }
  0x15   :  { %s22_s16 = sshll.u32 %s693_s15, 4  ;;  %s45_s18 = sshll.u32 %s694_s17, 4  ;;  %s23_s16 = int_to_ptr.vmem [resolvable:$true] %s22_s16  ;;  %s46_s18 = int_to_ptr.vmem [resolvable:$true] %s45_s18 }
  0x16   :  { %s594_s21 = scalar_lea.hbm %s838_s0, 128 }
  0x17   :  { %p595_p8 = scmp.ne.s32.totalorder %s838_s0, %s594_s21  ;;  %p598_p9 = scmp.lt.u32.totalorder %s594_s21, %s838_s0 }
  0x19   :  { %p600_p10 = pnand %p598_p9, %p595_p8 }
  0x1b   :  { %603 = shalt.err (!%p600_p10)
}
  0x1c   :  { %s604_s1 = scalar_lea.vmem %s23_s16, 128  ;;  %p609_p12 = scmp.lt.s32.totalorder %s23_s16, %s23_s16 }
  0x1d   :  { %p605_p11 = scmp.ne.s32.totalorder %s23_s16, %s604_s1  ;;  %p610_p13 = scmp.lt.s32.totalorder %s604_s1, %s604_s1 }
  0x1f   :  { %p611_p0 = por %p610_p13, %p609_p12 }
  0x21   :  { %p612_p1 = pnand %p611_p0, %p605_p11 }
  0x23   :  { %615 = shalt.err (!%p612_p1)
}
  0x24   :  { %25 = dma.hbm_to_vmem [thread:$0]  %s838_s0, 128, %s23_s16, [#allocation3]  }
  0x25   :  { %s616_s30 = scalar_lea.hbm %s841_s3, 2048 }
  0x26   :  { %p617_p2 = scmp.ne.s32.totalorder %s841_s3, %s616_s30  ;;  %p620_p3 = scmp.lt.u32.totalorder %s616_s30, %s841_s3 }
  0x28   :  { %p622_p4 = pnand %p620_p3, %p617_p2 }
  0x2a   :  { %625 = shalt.err (!%p622_p4)
}
  0x2b   :  { %s626_s14 = scalar_lea.vmem %s46_s18, 2048  ;;  %p631_p6 = scmp.lt.s32.totalorder %s46_s18, %s46_s18 }
  0x2c   :  { %p627_p5 = scmp.ne.s32.totalorder %s46_s18, %s626_s14  ;;  %p632_p7 = scmp.lt.s32.totalorder %s626_s14, %s626_s14 }
  0x2e   :  { %p633_p8 = por %p632_p7, %p631_p6 }
  0x30   :  { %p634_p9 = pnand %p633_p8, %p627_p5 }
  0x32   :  { %637 = shalt.err (!%p634_p9)
}
  0x33   :  { %51 = dma.hbm_to_vmem [thread:$0]  %s841_s3, 2048, %s46_s18, [#allocation6], %s691_s11, %s691_s11, %s692_s12  }
  0x34   :  { %s695_s16 = smov [#allocation8]   ;;  %s638_s21 = scalar_lea.hbm %s843_s5, 2048 }
  0x35   :  { %s59_s17 = sshll.u32 %s695_s16, 4  ;;  %p639_p10 = scmp.ne.s32.totalorder %s843_s5, %s638_s21  ;;  %s60_s17 = int_to_ptr.vmem [resolvable:$true] %s59_s17 }
  0x36   :  { %p642_p11 = scmp.lt.u32.totalorder %s638_s21, %s843_s5 }
  0x38   :  { %p644_p12 = pnand %p642_p11, %p639_p10 }
  0x3a   :  { %647 = shalt.err (!%p644_p12)
}
  0x3b   :  { %s648_s1 = scalar_lea.vmem %s60_s17, 2048  ;;  %p653_p0 = scmp.lt.s32.totalorder %s60_s17, %s60_s17 }
  0x3c   :  { %p649_p13 = scmp.ne.s32.totalorder %s60_s17, %s648_s1  ;;  %p654_p1 = scmp.lt.s32.totalorder %s648_s1, %s648_s1 }
  0x3e   :  { %p655_p2 = por %p654_p1, %p653_p0 }
  0x40   :  { %p656_p3 = pnand %p655_p2, %p649_p13 }
  0x42   :  { %659 = shalt.err (!%p656_p3)
}
  0x43   :  { %65 = dma.hbm_to_vmem [thread:$0]  %s843_s5, 2048, %s60_s17, [#allocation9], %s691_s11, %s691_s11, %s692_s12  }
  0x44   :  { %682 = dma.done.wait [#allocation3], 128  }
  0x45   :  { %683 = vsyncadd [#allocation3], 4294967168 }
  0x46   :  { %684 = dma.done.wait [#allocation6], 2304  }
  0x47   :  { %685 = vsyncadd [#allocation6], 4294964992 }
  0x48   :  { %686 = dma.done.wait [#allocation9], 2048  }
  0x49   :  { %687 = vsyncadd [#allocation9], 4294965248  ;;  %v696_v0 = vmov 0.0|0.0   ;;  %vm697_vm0 = vmmov 0   ;;  %v698_v1 = vmov 0.0   ;;  %v81_v2 = vld [vmem:[#allocation5] sm:$0xff] }
  0x4a   :  { %503 = vmatprep.subr.bf16.mxu0 %v696_v0  ;;  %430 = vmatprep.mubr.msk.f32.mxu0 %vm697_vm0, %v698_v1  ;;  %v82_v3 = vld [vmem:[#allocation5 + $0x8] sm:$0xff]  ;;  %v165_v5 = vld [vmem:[#allocation7] sm:$0xff]  ;;  %v166_v6 = vld [vmem:[#allocation7 + $0x8] sm:$0xff]  ;;  %vm90_vm1 = vcmask 130048  }
  0x4b   :  { %506 = vmatprep.subr.bf16.mxu1 %v696_v0  ;;  %465 = vmatprep.mubr.msk.f32.mxu1 %vm697_vm0, %v698_v1  ;;  %v504_v4 = vpack.c.bf16 %v82_v3, %v81_v2  ;;  %v167_v7 = vld [vmem:[#allocation7 + $0x10] sm:$0xff]  ;;  %v507_v8 = vpack.c.bf16 %v166_v6, %v165_v5  ;;  %v168_v9 = vld [vmem:[#allocation7 + $0x18] sm:$0xff]  ;;  %v80_v10 = vld [vmem:[#allocation2] sm:$0xff] }
  0x4c   :  { %v510_v11 = vpack.c.bf16 %v168_v9, %v167_v7  ;;  %v169_v12 = vld [vmem:[#allocation7 + $0x20] sm:$0xff]  ;;  %v170_v13 = vld [vmem:[#allocation7 + $0x28] sm:$0xff]  ;;  %v171_v15 = vld [vmem:[#allocation7 + $0x30] sm:$0xff] }
  0x4d   :  { %505 = vmatpush3.bf16.msra.mxu0 %v504_v4  ;;  %508 = vmatpush3.bf16.msra.mxu1 %v507_v8  ;;  %v513_v14 = vpack.c.bf16 %v170_v13, %v169_v12  ;;  %v172_v16 = vld [vmem:[#allocation7 + $0x38] sm:$0xff]  ;;  %v173_v18 = vld [vmem:[#allocation7 + $0x40] sm:$0xff]  ;;  %v174_v19 = vld [vmem:[#allocation7 + $0x48] sm:$0xff] }
  0x4e   :  { %530 = vmatprep.subr.bf16.mxu0 %v696_v0  ;;  %509 = vmatprep.subr.bf16.mxu1 %v696_v0  ;;  %v516_v17 = vpack.c.bf16 %v172_v16, %v171_v15  ;;  %v519_v20 = vpack.c.bf16 %v174_v19, %v173_v18  ;;  %v175_v21 = vld [vmem:[#allocation7 + $0x50] sm:$0xff]  ;;  %v176_v22 = vld [vmem:[#allocation7 + $0x58] sm:$0xff]  ;;  %v177_v24 = vld [vmem:[#allocation7 + $0x60] sm:$0xff] }
  0x4f   :  { %v522_v23 = vpack.c.bf16 %v176_v22, %v175_v21  ;;  %v178_v25 = vld [vmem:[#allocation7 + $0x68] sm:$0xff]  ;;  %v179_v27 = vld [vmem:[#allocation7 + $0x70] sm:$0xff]  ;;  %v180_v28 = vld [vmem:[#allocation7 + $0x78] sm:$0xff] }
  0x50   :  { %431 = vmatmul.mubr.msk.f32.vlgmr.msra.gmra.mrb[0].mxu0 %vm90_vm1, %v80_v10  ;;  %v525_v26 = vpack.c.bf16 %v178_v25, %v177_v24  ;;  %v528_v29 = vpack.c.bf16 %v180_v28, %v179_v27  ;;  %v259_v30 = vld [vmem:[#allocation8] sm:$0xff]  ;;  %v260_v31 = vld [vmem:[#allocation8 + $0x8] sm:$0xff]  ;;  %v261_v32 = vld [vmem:[#allocation8 + $0x10] sm:$0xff] }
  0x51   :  { %500 = vmatprep.mubr.msk.f32.mxu0 %vm697_vm0, %v698_v1  ;;  %511 = vmatpush3.bf16.msra.mxu1 %v510_v11  ;;  %v531_v33 = vpack.c.bf16 %v260_v31, %v259_v30  ;;  %v262_v34 = vld [vmem:[#allocation8 + $0x18] sm:$0xff]  ;;  %v263_v36 = vld [vmem:[#allocation8 + $0x20] sm:$0xff]  ;;  %v264_v37 = vld [vmem:[#allocation8 + $0x28] sm:$0xff]  ;;  %v352_v1 = vlaneseq }
  0x52   :  { %512 = vmatprep.subr.bf16.mxu1 %v696_v0  ;;  %v534_v35 = vpack.c.bf16 %v262_v34, %v261_v32  ;;  %v537_v38 = vpack.c.bf16 %v264_v37, %v263_v36  ;;  %v265_v39 = vld [vmem:[#allocation8 + $0x30] sm:$0xff]  ;;  %v266_v40 = vld [vmem:[#allocation8 + $0x38] sm:$0xff]  ;;  %v267_v42 = vld [vmem:[#allocation8 + $0x40] sm:$0xff] }
  0x53   :  { %532 = vmatpush3.bf16.msra.mxu0 %v531_v33  ;;  %v540_v41 = vpack.c.bf16 %v266_v40, %v265_v39  ;;  %v268_v43 = vld [vmem:[#allocation8 + $0x48] sm:$0xff]  ;;  %v269_v50 = vld [vmem:[#allocation8 + $0x50] sm:$0xff]  ;;  %v270_v51 = vld [vmem:[#allocation8 + $0x58] sm:$0xff]  ;;  %v353_v2 = vand.u32 127, %v352_v1 }
  0x54   :  { %533 = vmatprep.subr.bf16.mxu0 %v696_v0  ;;  %v543_v44 = vpack.c.bf16 %v268_v43, %v267_v42  ;;  %v385_v45 = vld [vmem:[%s840_s2] ss:$0 sm:$0xff]  ;;  %v546_v52 = vpack.c.bf16 %v270_v51, %v269_v50  ;;  %v271_v53 = vld [vmem:[#allocation8 + $0x60] sm:$0xff]  ;;  %v273_v56 = vld [vmem:[#allocation8 + $0x70] sm:$0xff] }
  0x55   :  { %514 = vmatpush3.bf16.msra.mxu1 %v513_v14  ;;  %v272_v54 = vld [vmem:[#allocation8 + $0x68] sm:$0xff]  ;;  %v274_v57 = vld [vmem:[#allocation8 + $0x78] sm:$0xff]  ;;  %vm354_vm2 = vcmp.lt.s32.totalorder %v353_v2, 4  ;;  %vm365_vm3 = vcmp.eq.s32.totalorder %v353_v2, 4 }
  0x56   :  { %515 = vmatprep.subr.bf16.mxu1 %v696_v0  ;;  %v549_v55 = vpack.c.bf16 %v272_v54, %v271_v53  ;;  %v552_v58 = vpack.c.bf16 %v274_v57, %v273_v56  ;;  %v387_v59 = vld [vmem:[%s842_s4] ss:$0 sm:$0xff]  ;;  %s699_s4 = smov [#allocation10]  }
  0x57   :  { %535 = vmatpush3.bf16.msra.mxu0 %v534_v35  ;;  %v388_v3 = vld [vmem:[%s844_s6] ss:$0 sm:$0xff]  ;;  %s374_s28 = sshll.u32 %s699_s4, 4  ;;  %s375_s28 = int_to_ptr.vmem [resolvable:$true] %s374_s28 }
  0x58   :  { %536 = vmatprep.subr.bf16.mxu0 %v696_v0  ;;  %s660_s6 = scalar_lea.vmem %s375_s28, 128  ;;  %p665_p5 = scmp.lt.s32.totalorder %s375_s28, %s375_s28 }
  0x59   :  { %517 = vmatpush3.bf16.msra.mxu1 %v516_v17  ;;  %p661_p4 = scmp.ne.s32.totalorder %s375_s28, %s660_s6  ;;  %p666_p6 = scmp.lt.s32.totalorder %s660_s6, %s660_s6 }
  0x5a   :  { %518 = vmatprep.subr.bf16.mxu1 %v696_v0 }
  0x5b   :  { %538 = vmatpush3.bf16.msra.mxu0 %v537_v38  ;;  %p667_p7 = por %p666_p6, %p665_p5 }
  0x5c   :  { %539 = vmatprep.subr.bf16.mxu0 %v696_v0 }
  0x5d   :  { %520 = vmatpush3.bf16.msra.mxu1 %v519_v20  ;;  %p668_p8 = pnand %p667_p7, %p661_p4 }
  0x5e   :  { %521 = vmatprep.subr.bf16.mxu1 %v696_v0 }
  0x5f   :  { %541 = vmatpush3.bf16.msra.mxu0 %v540_v41 }
  0x60   :  { %542 = vmatprep.subr.bf16.mxu0 %v696_v0 }
  0x61   :  { %523 = vmatpush3.bf16.msra.mxu1 %v522_v23 }
  0x62   :  { %524 = vmatprep.subr.bf16.mxu1 %v696_v0 }
  0x63   :  { %544 = vmatpush3.bf16.msra.mxu0 %v543_v44 }
  0x64   :  { %545 = vmatprep.subr.bf16.mxu0 %v696_v0 }
  0x65   :  { %526 = vmatpush3.bf16.msra.mxu1 %v525_v26 }
  0x66   :  { %527 = vmatprep.subr.bf16.mxu1 %v696_v0 }
  0x67   :  { %547 = vmatpush3.bf16.msra.mxu0 %v546_v52 }
  0x68   :  { %548 = vmatprep.subr.bf16.mxu0 %v696_v0 }
  0x69   :  { %529 = vmatpush3.bf16.msra.mxu1 %v528_v29 }
  0x6b   :  { %550 = vmatpush3.bf16.msra.mxu0 %v549_v55 }
  0x6c   :  { %551 = vmatprep.subr.bf16.mxu0 %v696_v0 }
  0x6f   :  { %553 = vmatpush3.bf16.msra.mxu0 %v552_v58 }
 0x123   :  { %v160_v46 = vpop.f32.mrb[0].mxu0 }
 0x124   :  { %v161_v47 = vadd.f32 %v385_v45, %v160_v46  ;;  %v432_v48 = vpop.f32.mrb[1].mxu0 }
 0x126   :  { %564 = vtanh.f32 %v161_v47 }
 0x130   :  { %v565_v49 = vpop.eup %564 }
 0x131   :  { %466 = vmatmul.mubr.f32.vlgmr.msra.gmra.mrb[0].mxu1 %v565_v49 }
 0x204   :  { %v254_v60 = vpop.f32.mrb[0].mxu1 }
 0x205   :  { %v255_v61 = vadd.f32 %v387_v59, %v254_v60  ;;  %v467_v62 = vpop.f32.mrb[1].mxu1 }
 0x207   :  { %566 = vtanh.f32 %v255_v61 }
 0x211   :  { %v567_v63 = vpop.eup %566 }
 0x212   :  { %501 = vmatmul.mubr.f32.vlgmr.msra.gmra.mrb[2].mxu0 %v567_v63 }
 0x2e5   :  { %v348_v4 = vpop.f32.mrb[2].mxu0 }
 0x2e6   :  { %v349_v0 = vadd.f32 %v388_v3, %v348_v4  ;;  %v502_v5 = vpop.f32.mrb[3].mxu0 }
 0x2e8   :  { %v355_v6 = vsel %vm354_vm2, %v349_v0, -inf }
 0x2e9   :  { %356 = vmax.xlane.f32.xlu0 %v355_v6 }
 0x376   :  { %v357_v7 = vpop.xlane.xlu0 %356 }
 0x377   :  { %v358_v8 = vsub.f32 %v355_v6, %v357_v7 }
 0x379   :  { %v359_v9 = vmul.f32 1.442695, %v358_v8 }
 0x37b   :  { %568 = vpow2.f32 %v359_v9 }
 0x385   :  { %v569_v10 = vpop.eup %568 }
 0x386   :  { %361 = vadd.xlane.f32.xlu0 %v569_v10 }
 0x413   :  { %v362_v11 = vpop.xlane.xlu0 %361 }
 0x414   :  { %570 = vrcp.f32 %v362_v11 }
 0x41e   :  { %v571_v12 = vpop.eup %570 }
 0x41f   :  { %v364_v13 = vmul.f32 %v571_v12, %v569_v10 }
 0x421   :  { %v366_v14 = vsel %vm365_vm3, %v349_v0, %v364_v13 }
 0x422   :  { %367 = vst [vmem:[#allocation10] sm:$0xff] %v366_v14 }
 0x423   :  { %671 = shalt.err (!%p668_p8)
}
 0x424   :  { %s672_s8 = scalar_lea.hbm %s845_s7, 128 }
 0x425   :  { %p673_p9 = scmp.ne.s32.totalorder %s845_s7, %s672_s8  ;;  %p676_p10 = scmp.lt.u32.totalorder %s672_s8, %s845_s7 }
 0x427   :  { %p678_p11 = pnand %p676_p10, %p673_p9 }
 0x429   :  { %681 = shalt.err (!%p678_p11)
}
 0x42a   :  { %377 = dma.vmem_to_hbm [thread:$0]  %s375_s28, 128, %s845_s7, [#allocation4]  }
 0x42b   :  { %688 = dma.done.wait [#allocation4], 128  }
 0x42c   :  { %689 = vsyncadd [#allocation4], 4294967168 }
 0x42d   :  { %381 = vsyncpa [#allocation3], 1 }
 0x42e   :  { %382 = vsyncpa [#allocation6], 1 }
 0x42f   :  { %383 = vsyncpa [#allocation9], 1 }
 0x430   :  { %384 = vsyncpa [#allocation4], 1 }

</bundles_post_ra>
